<compile_context>
chip_gen: v6e
topology: v6e:2x2x1
jax: 0.10.0
libtpu: 0.0.40
codegen_flags: <defaults>
</compile_context>

<pallas_src>
import jax
import jax.numpy as jnp
from jax import lax
from jax.experimental import pallas as pl
from jax.experimental.pallas import tpu as pltpu

EPS = 1e-5


def _ln_kernel_bias(x_ref, w_ref, b_ref, o_ref):
    # x_ref: (tm, D)   w_ref/b_ref: (1, D)   o_ref: (tm, D)
    x = x_ref[...].astype(jnp.float32)
    mean = jnp.mean(x, axis=-1, keepdims=True)
    meansq = jnp.mean(x * x, axis=-1, keepdims=True)
    # Biased variance via E[x^2] - mean^2 (single pass over x); clamp guards
    # against f32 cancellation producing a tiny negative value.
    var = jnp.maximum(meansq - mean * mean, 0.0)
    inv = lax.rsqrt(var + EPS)
    w = w_ref[...].astype(jnp.float32)
    b = b_ref[...].astype(jnp.float32)
    o_ref[...] = ((x - mean) * inv * w + b).astype(o_ref.dtype)


def _ln_kernel_nobias(x_ref, w_ref, o_ref):
    x = x_ref[...].astype(jnp.float32)
    mean = jnp.mean(x, axis=-1, keepdims=True)
    meansq = jnp.mean(x * x, axis=-1, keepdims=True)
    var = jnp.maximum(meansq - mean * mean, 0.0)
    inv = lax.rsqrt(var + EPS)
    w = w_ref[...].astype(jnp.float32)
    o_ref[...] = ((x - mean) * inv * w).astype(o_ref.dtype)


def _sublane_multiple(dtype):
    # Native sublane packing: f32 -> 8, bf16/f16 -> 16, int8/fp8 -> 32.
    return {4: 8, 2: 16, 1: 32}.get(jnp.dtype(dtype).itemsize, 8)


def _vmem_plan():
    """Return (row-tile VMEM budget, scoped vmem_limit_bytes) per TPU gen."""
    try:
        phys = int(pltpu.get_tpu_info().vmem_capacity_bytes)
    except Exception:
        phys = 0
    if phys >= (128 << 20):          # v5e / v6e: 128 MiB physical VMEM
        return 64 << 20, 100 << 20
    if phys > 0:                     # v7x: 64 MiB physical VMEM per TC
        return 36 << 20, 52 << 20
    return 32 << 20, 48 << 20        # unknown backend: conservative


def _pick_block_rows(R, D, dtype, vmem_budget_bytes):
    s = _sublane_multiple(dtype)
    if R <= s:
        # Single block whose row extent equals the full array dim (allowed).
        return R
    itemsize = jnp.dtype(dtype).itemsize
    # Resident bytes per tile row: double-buffered input + output tiles,
    # plus ~2 live f32 temporaries of width D (single-pass stats kernel).
    bytes_per_row = (2 + 2) * D * itemsize + 8 * D
    rows = vmem_budget_bytes // max(bytes_per_row, 1)
    rows = (rows // s) * s
    rows = max(s, min(2048, rows))
    # Guarantee >= 2 grid steps when there is enough work, so the "parallel"
    # row axis can shard across both TensorCores on v7x.
    if R > 2 * s:
        half = -(-R // 2)            # cdiv(R, 2)
        half = (-(-half // s)) * s   # round up to sublane multiple
        rows = min(rows, half)
    # Never larger than the (sublane-aligned) total row count.
    rows = min(rows, (R // s) * s)
    return rows


def layer_norm(x, weight, bias=None, *, block_rows=None):
    """LayerNorm over the last axis of x. weight/bias have shape (D,)."""
    orig_shape = x.shape
    D = orig_shape[-1]
    x2 = x.reshape(-1, D)
    R = x2.shape[0]

    vmem_budget, vmem_limit = _vmem_plan()
    if block_rows is None:
        block_rows = _pick_block_rows(R, D, x2.dtype, vmem_budget)

    grid = (pl.cdiv(R, block_rows),)   # partial last block handled by Pallas
    w2 = weight.reshape(1, D)

    row_spec = pl.BlockSpec((block_rows, D), lambda i: (i, 0))
    # Constant block index -> Pallas skips re-DMA of this tile between steps.
    wb_spec = pl.BlockSpec((1, D), lambda i: (0, 0))

    compiler_params = pltpu.CompilerParams(
        dimension_semantics=("parallel",),
        vmem_limit_bytes=int(vmem_limit),
    )

    if bias is None:
        out = pl.pallas_call(
            _ln_kernel_nobias,
            out_shape=jax.ShapeDtypeStruct((R, D), x.dtype),
            grid_spec=pltpu.PrefetchScalarGridSpec(
                num_scalar_prefetch=0,
                grid=grid,
                in_specs=[row_spec, wb_spec],
                out_specs=row_spec,
            ),
            compiler_params=compiler_params,
        )(x2, w2)
    else:
        b2 = bias.reshape(1, D)
        out = pl.pallas_call(
            _ln_kernel_bias,
            out_shape=jax.ShapeDtypeStruct((R, D), x.dtype),
            grid_spec=pltpu.PrefetchScalarGridSpec(
                num_scalar_prefetch=0,
                grid=grid,
                in_specs=[row_spec, wb_spec, wb_spec],
                out_specs=row_spec,
            ),
            compiler_params=compiler_params,
        )(x2, w2, b2)

    return out.reshape(orig_shape)


def _ref_layer_norm(x, weight, bias):
    xf = x.astype(jnp.float32)
    mean = jnp.mean(xf, axis=-1, keepdims=True)
    var = jnp.mean((xf - mean) ** 2, axis=-1, keepdims=True)
    y = (xf - mean) * lax.rsqrt(var + EPS) * weight.astype(jnp.float32)
    if bias is not None:
        y = y + bias.astype(jnp.float32)
    return y.astype(x.dtype)


if __name__ == "__main__":
    key = jax.random.PRNGKey(0)
    B, T, D = 2, 8, 32

    # Deterministic parameter init (matches nn.Parameter(torch.ones/zeros)).
    weight = jnp.ones((D,), dtype=jnp.float32)
    bias = jnp.zeros((D,), dtype=jnp.float32)

    x = jax.random.normal(key, (B, T, D), dtype=jnp.float32)

    # bias=True path
    out = layer_norm(x, weight, bias)
    jax.block_until_ready(out)
    ref = _ref_layer_norm(x, weight, bias)
    assert jnp.allclose(out, ref, atol=1e-5, rtol=1e-5), "mismatch (bias=True)"

    # bias=False path (bias is None in the module)
    out_nb = layer_norm(x, weight, None)
    jax.block_until_ready(out_nb)
    ref_nb = _ref_layer_norm(x, weight, None)
    assert jnp.allclose(out_nb, ref_nb, atol=1e-5, rtol=1e-5), "mismatch (bias=False)"

    # bf16 path (exercises the 16-row sublane multiple).
    xb = x.astype(jnp.bfloat16)
    out_bf = layer_norm(xb, weight.astype(jnp.bfloat16), bias.astype(jnp.bfloat16))
    jax.block_until_ready(out_bf)
    ref_bf = _ref_layer_norm(xb, weight, bias)
    assert jnp.allclose(out_bf.astype(jnp.float32), ref_bf.astype(jnp.float32),
                        atol=2e-2, rtol=2e-2), "mismatch (bf16)"

    # Non-divisible row count (exercises the padded partial last block and
    # the >=2-grid-step split).
    x_odd = jax.random.normal(jax.random.PRNGKey(1), (3, 5, D), dtype=jnp.float32)
    out_odd = layer_norm(x_odd, weight, bias)
    jax.block_until_ready(out_odd)
    ref_odd = _ref_layer_norm(x_odd, weight, bias)
    assert jnp.allclose(out_odd, ref_odd, atol=1e-5, rtol=1e-5), "mismatch (partial block)"

    print("KERNEL_OK")
</pallas_src>

<mosaic_0001>
module attributes {stable_mosaic.version = 11 : i64} {
  func.func @_ln_kernel_bias(%arg0: i32, %arg1: memref<16x32xf32, #tpu.memory_space<vmem>>, %arg2: memref<1x32xf32, #tpu.memory_space<vmem>>, %arg3: memref<1x32xf32, #tpu.memory_space<vmem>>, %arg4: memref<16x32xf32, #tpu.memory_space<vmem>>) attributes {dimension_semantics = [#tpu.dimension_semantics<parallel>], iteration_bounds = array<i64: 1>, scalar_prefetch = 0 : i64, scratch_operands = 0 : i64, tpu.core_type = #tpu.core_type<tc>, window_params = [{transform_indices = @transform_0, window_bounds = array<i64: 16, 32>}, {pipeline_mode = #tpu.pipeline_mode<synchronous>, transform_indices = @transform_1, window_bounds = array<i64: 1, 32>}, {pipeline_mode = #tpu.pipeline_mode<synchronous>, transform_indices = @transform_2, window_bounds = array<i64: 1, 32>}, {transform_indices = @transform_3, window_bounds = array<i64: 16, 32>}]} {
    %c0 = arith.constant 0 : index
    %c0_0 = arith.constant 0 : index
    %0 = vector.load %arg1[%c0, %c0_0] : memref<16x32xf32, #tpu.memory_space<vmem>>, vector<16x32xf32>
    %cst = arith.constant dense<0.000000e+00> : vector<16xf32>
    %1 = vector.multi_reduction <add>, %0, %cst [1] : vector<16x32xf32> to vector<16xf32>
    %2 = vector.shape_cast %1 : vector<16xf32> to vector<16x1xf32>
    %cst_1 = arith.constant 3.200000e+01 : f32
    %3 = vector.broadcast %cst_1 : f32 to vector<16x1xf32>
    %4 = arith.divf %2, %3 : vector<16x1xf32>
    %5 = arith.mulf %0, %0 : vector<16x32xf32>
    %cst_2 = arith.constant dense<0.000000e+00> : vector<16xf32>
    %6 = vector.multi_reduction <add>, %5, %cst_2 [1] : vector<16x32xf32> to vector<16xf32>
    %7 = vector.shape_cast %6 : vector<16xf32> to vector<16x1xf32>
    %cst_3 = arith.constant 3.200000e+01 : f32
    %8 = vector.broadcast %cst_3 : f32 to vector<16x1xf32>
    %9 = arith.divf %7, %8 : vector<16x1xf32>
    %10 = arith.mulf %4, %4 : vector<16x1xf32>
    %11 = arith.subf %9, %10 : vector<16x1xf32>
    %cst_4 = arith.constant 0.000000e+00 : f32
    %12 = vector.broadcast %cst_4 : f32 to vector<16x1xf32>
    %13 = arith.maximumf %11, %12 : vector<16x1xf32>
    %cst_5 = arith.constant 9.99999974E-6 : f32
    %14 = vector.broadcast %cst_5 : f32 to vector<16x1xf32>
    %15 = arith.addf %13, %14 : vector<16x1xf32>
    %16 = math.rsqrt %15 : vector<16x1xf32>
    %c0_6 = arith.constant 0 : index
    %c0_7 = arith.constant 0 : index
    %17 = vector.load %arg2[%c0_6, %c0_7] : memref<1x32xf32, #tpu.memory_space<vmem>>, vector<1x32xf32>
    %c0_8 = arith.constant 0 : index
    %c0_9 = arith.constant 0 : index
    %18 = vector.load %arg3[%c0_8, %c0_9] : memref<1x32xf32, #tpu.memory_space<vmem>>, vector<1x32xf32>
    %19 = vector.broadcast %4 : vector<16x1xf32> to vector<16x32xf32>
    %20 = arith.subf %0, %19 : vector<16x32xf32>
    %21 = vector.broadcast %16 : vector<16x1xf32> to vector<16x32xf32>
    %22 = arith.mulf %20, %21 : vector<16x32xf32>
    %23 = vector.broadcast %17 : vector<1x32xf32> to vector<16x32xf32>
    %24 = arith.mulf %22, %23 : vector<16x32xf32>
    %25 = vector.broadcast %18 : vector<1x32xf32> to vector<16x32xf32>
    %26 = arith.addf %24, %25 : vector<16x32xf32>
    %c0_10 = arith.constant 0 : index
    %c0_11 = arith.constant 0 : index
    %27 = vector.load %arg4[%c0_10, %c0_11] : memref<16x32xf32, #tpu.memory_space<vmem>>, vector<16x32xf32>
    tpu.vector_store %arg4[%c0_10, %c0_11], %26 {strides = array<i32>} : memref<16x32xf32, #tpu.memory_space<vmem>>, vector<16x32xf32>,
    return
  }
  func.func @transform_0(%arg0: i32) -> (i32, i32) {
    %c0_i32 = arith.constant 0 : i32
    %c0_i32_0 = arith.constant 0 : i32
    return %arg0, %c0_i32 : i32, i32
  }
  func.func @transform_1(%arg0: i32) -> (i32, i32) {
    %c0_i32 = arith.constant 0 : i32
    %c0_i32_0 = arith.constant 0 : i32
    %c0_i32_1 = arith.constant 0 : i32
    return %c0_i32, %c0_i32_0 : i32, i32
  }
  func.func @transform_2(%arg0: i32) -> (i32, i32) {
    %c0_i32 = arith.constant 0 : i32
    %c0_i32_0 = arith.constant 0 : i32
    %c0_i32_1 = arith.constant 0 : i32
    return %c0_i32, %c0_i32_0 : i32, i32
  }
  func.func @transform_3(%arg0: i32) -> (i32, i32) {
    %c0_i32 = arith.constant 0 : i32
    %c0_i32_0 = arith.constant 0 : i32
    return %arg0, %c0_i32 : i32, i32
  }
}

</mosaic_0001>

<bundles_post_ra>
// kernel: tpu_custom_call.1
= control target key start
LH: loop header
LB: loop body
LE: loop exit
PB: predicated region body
PF: predicated region fallthrough
CT: control target
= control target key end

     0   :  { %8 = vsyncpa [#allocation3], 0  ;;  %s204_s0 = inlined_call_operand.hbm [shape: f32[16,32], index: 0, kind: input, shape index: {}]   ;;  %s205_s1 = inlined_call_operand.vmem [shape: f32[1,32], index: 1, kind: input, shape index: {}]   ;;  %s206_s2 = inlined_call_operand.vmem [shape: f32[1,32], index: 2, kind: input, shape index: {}]   ;;  %s207_s3 = inlined_call_operand.hbm [shape: f32[16,32], index: 3, kind: output, shape index: {}]  }
   0x1   :  { %9 = vsyncpa [#allocation4], 0  ;;  %s156_s12 = smov [#allocation2]  }
   0x2   :  { %s15_s13 = sshll.u32 %s156_s12, 4  ;;  %s16_s13 = int_to_ptr.vmem [resolvable:$true] %s15_s13 }
   0x3   :  { %s120_s14 = scalar_lea.vmem %s16_s13, 256  ;;  %p125_p1 = scmp.lt.s32.totalorder %s16_s13, %s16_s13 }
   0x4   :  { %p121_p0 = scmp.ne.s32.totalorder %s16_s13, %s120_s14  ;;  %p126_p2 = scmp.lt.s32.totalorder %s120_s14, %s120_s14 }
   0x6   :  { %p127_p3 = por %p126_p2, %p125_p1 }
   0x8   :  { %p128_p4 = pnand %p127_p3, %p121_p0 }
   0xa   :  { %131 = shalt.err (!%p128_p4)
}
   0xb   :  { %s157_s15 = smov 128   ;;  %s158_s16 = smov 8  }
   0xc   :  { %21 = dma.hbm_to_vmem [thread:$0]  %s204_s0, 256, %s16_s13, [#allocation3], %s157_s15, %s157_s15, %s158_s16  }
   0xd   :  { %152 = dma.done.wait [#allocation3], 256  }
   0xe   :  { %153 = vsyncadd [#allocation3], 4294967040  ;;  %vm31_vm0 = vcmask 261120   ;;  %v29_v0 = vld [vmem:[#allocation2] sm:$0xff]  ;;  %v30_v1 = vld [vmem:[#allocation2 + $0x8] sm:$0xff]  ;;  %s159_s22 = smov [#allocation5]  }
   0xf   :  { %v32_v2 = vsel %vm31_vm0, %v29_v0, 0.0  ;;  %v41_v3 = vmul.f32 %v29_v0, %v29_v0  ;;  %v42_v4 = vmul.f32 %v30_v1, %v30_v1  ;;  %v35_v6 = vsel %vm31_vm0, %v30_v1, 0.0  ;;  %v102_v26 = vld [vmem:[%s205_s1] ss:$0 sm:$0xff]  ;;  %s90_s23 = sshll.u32 %s159_s22, 4  ;;  %s91_s23 = int_to_ptr.vmem [resolvable:$true] %s90_s23 }
  0x10   :  { %33 = vadd.xlane.f32.xlu0 %v32_v2  ;;  %v103_v28 = vld [vmem:[%s206_s2] ss:$0 sm:$0xff]  ;;  %s132_s1 = scalar_lea.vmem %s91_s23, 256  ;;  %p137_p6 = scmp.lt.s32.totalorder %s91_s23, %s91_s23 }
  0x11   :  { %v43_v5 = vsel %vm31_vm0, %v41_v3, 0.0  ;;  %v46_v7 = vsel %vm31_vm0, %v42_v4, 0.0  ;;  %p133_p5 = scmp.ne.s32.totalorder %s91_s23, %s132_s1  ;;  %p138_p7 = scmp.lt.s32.totalorder %s132_s1, %s132_s1 }
  0x12   :  { %44 = vadd.xlane.f32.xlu1 %v43_v5 }
  0x13   :  { %p139_p8 = por %p138_p7, %p137_p6 }
  0x14   :  { %36 = vadd.xlane.f32.xlu0 %v35_v6 }
  0x15   :  { %p140_p9 = pnand %p139_p8, %p133_p5 }
  0x16   :  { %47 = vadd.xlane.f32.xlu1 %v46_v7 }
  0x99   :  { %v34_v8 = vpop.xlane.xlu0 %33 }
  0x9a   :  { %v39_v9 = vmul.f32 0.03125, %v34_v8 }
  0x9b   :  { %v45_v10 = vpop.xlane.xlu1 %44 }
  0x9c   :  { %v51_v11 = vmul.f32 %v39_v9, %v39_v9  ;;  %v49_v12 = vmul.f32 0.03125, %v45_v10  ;;  %v63_v24 = vsub.f32 %v29_v0, %v39_v9 }
  0x9d   :  { %v37_v13 = vpop.xlane.xlu0 %36 }
  0x9e   :  { %v53_v14 = vsub.f32 %v49_v12, %v51_v11  ;;  %v40_v15 = vmul.f32 0.03125, %v37_v13 }
  0x9f   :  { %v48_v16 = vpop.xlane.xlu1 %47 }
  0xa0   :  { %v55_v17 = vmax.f32 %v53_v14, 0.0  ;;  %v52_v18 = vmul.f32 %v40_v15, %v40_v15  ;;  %v50_v19 = vmul.f32 0.03125, %v48_v16  ;;  %v64_v29 = vsub.f32 %v30_v1, %v40_v15 }
  0xa2   :  { %v57_v20 = vadd.f32 1e-05, %v55_v17  ;;  %v54_v21 = vsub.f32 %v50_v19, %v52_v18 }
  0xa4   :  { %108 = vrsqrt.f32 %v57_v20  ;;  %v56_v22 = vmax.f32 %v54_v21, 0.0 }
  0xa6   :  { %v58_v23 = vadd.f32 1e-05, %v56_v22 }
  0xa8   :  { %110 = vrsqrt.f32 %v58_v23 }
  0xb1   :  { %v109_v25 = vpop.eup %108 }
  0xb2   :  { %v65_v27 = vmul.f32 %v109_v25, %v63_v24 }
  0xb4   :  { %v73_v30 = vmul.f32 %v102_v26, %v65_v27 }
  0xb5   :  { %v111_v31 = vpop.eup %110 }
  0xb6   :  { %v66_v32 = vmul.f32 %v111_v31, %v64_v29  ;;  %v81_v33 = vadd.f32 %v103_v28, %v73_v30 }
  0xb8   :  { %v74_v34 = vmul.f32 %v102_v26, %v66_v32  ;;  %83 = vst.msk [vmem:[#allocation5] sm:$0xff] %vm31_vm0, %v81_v33 }
  0xba   :  { %v82_v35 = vadd.f32 %v103_v28, %v74_v34 }
  0xbc   :  { %84 = vst.msk [vmem:[#allocation5 + $0x8] sm:$0xff] %vm31_vm0, %v82_v35 }
  0xbd   :  { %143 = shalt.err (!%p140_p9)
}
  0xbe   :  { %96 = dma.vmem_to_hbm [thread:$0]  %s91_s23, 256, %s207_s3, [#allocation4], %s157_s15, %s157_s15, %s158_s16  }
  0xbf   :  { %154 = dma.done.wait [#allocation4], 256  }
  0xc0   :  { %155 = vsyncadd [#allocation4], 4294967040 }
  0xc1   :  { %100 = vsyncpa [#allocation3], 1 }
  0xc2   :  { %101 = vsyncpa [#allocation4], 1 }

</bundles_post_ra>
